<compile_context>
chip_gen: v7x
topology: tpu7x:2x2x1
jax: 0.10.0
libtpu: 0.0.40
codegen_flags: <defaults>
</compile_context>

<pallas_src>
import math

import jax
import jax.numpy as jnp
from jax.experimental import pallas as pl
from jax.experimental.pallas import tpu as pltpu


# -----------------------------------------------------------------------------
# Standalone Alpha.forward(): alpha = exp(log_alpha), (1, 1) f32.
# -----------------------------------------------------------------------------
def _alpha_kernel(log_alpha_ref, out_ref):
    # Single elementwise exp on the EUP; in/out alias the same VMEM buffer
    # (read happens before the write, so aliasing is safe).
    out_ref[...] = jnp.exp(log_alpha_ref[...])


def _alpha_pallas_call(log_alpha_2d):
    # (1, 1) f32: the last two dims equal the full array shape, so the (8, 128)
    # tiling constraint does not apply. No grid, no scratch, no pipelining —
    # any of that would only add per-step overhead to a 4-byte op.
    return pl.pallas_call(
        _alpha_kernel,
        out_shape=jax.ShapeDtypeStruct((1, 1), jnp.float32),
        in_specs=[pl.BlockSpec(memory_space=pltpu.VMEM)],
        out_specs=pl.BlockSpec(memory_space=pltpu.VMEM),
        input_output_aliases={0: 0},  # output reuses the input buffer
    )(log_alpha_2d)


# custom_vjp so jax.grad flows through the Pallas call:
#   alpha = exp(log_alpha)  =>  d alpha / d log_alpha = alpha
@jax.custom_vjp
def _alpha_exp(log_alpha_2d):
    return _alpha_pallas_call(log_alpha_2d)


def _alpha_exp_fwd(log_alpha_2d):
    alpha = _alpha_pallas_call(log_alpha_2d)
    return alpha, alpha  # residual is alpha itself


def _alpha_exp_bwd(alpha, g):
    # Plain-JAX multiply: fuses into the surrounding XLA graph; no extra launch.
    return (alpha * g,)


_alpha_exp.defvjp(_alpha_exp_fwd, _alpha_exp_bwd)


def make_alpha(initial_alpha: float):
    """Returns (params, forward_fn) mirroring Alpha.__init__ / Alpha.forward."""
    if not initial_alpha > 0.0:
        raise ValueError(f"initial_alpha must be > 0, got {initial_alpha}")
    # log_alpha = log(initial_alpha), stored (1, 1) f32 (optimal dtype on
    # v5e/v6e/v7x alike).
    log_alpha = jnp.full((1, 1), math.log(initial_alpha), dtype=jnp.float32)

    @jax.jit
    def forward(log_alpha_param):
        # PyTorch returns a 0-d tensor; jnp.squeeze is metadata-only (no extra
        # kernel launch).
        return jnp.squeeze(_alpha_exp(log_alpha_param))

    return log_alpha, forward


# -----------------------------------------------------------------------------
# Review-recommended production pattern: fold exp(log_alpha) into the kernel
# that consumes alpha. log_alpha is passed through SMEM; the exp costs one EUP
# push inside an otherwise compute-bound consumer and the standalone launch +
# scalar HBM round-trip vanish from the training step. The "consumer" here is
# a stand-in elementwise scale: out = x * exp(log_alpha).
# TODO(synk): in the real SAC step, this pattern belongs inside the actor /
# critic loss kernel, not a dedicated scale kernel.
# -----------------------------------------------------------------------------
_TM = 128


def _scale_by_alpha_kernel(log_alpha_smem, x_ref, o_ref):
    # Broadcast the SMEM scalar across the tile, then exp on the vector path
    # (broadcast-then-exp avoids relying on scalar-unit transcendentals).
    log_alpha_tile = jnp.full(x_ref.shape, log_alpha_smem[0], dtype=jnp.float32)
    o_ref[...] = x_ref[...] * jnp.exp(log_alpha_tile)


def scale_by_alpha(log_alpha, x):
    m, n = x.shape
    return pl.pallas_call(
        _scale_by_alpha_kernel,
        out_shape=jax.ShapeDtypeStruct((m, n), x.dtype),
        grid=(pl.cdiv(m, _TM),),
        in_specs=[
            pl.BlockSpec(memory_space=pltpu.SMEM),      # log_alpha scalar, full array
            pl.BlockSpec((_TM, n), lambda i: (i, 0)),   # x tiles
        ],
        out_specs=pl.BlockSpec((_TM, n), lambda i: (i, 0)),
        compiler_params=pltpu.CompilerParams(dimension_semantics=("parallel",)),
    )(log_alpha.reshape(1), x)


if __name__ == "__main__":
    # Deterministic setup: the module's only "input" is its parameter,
    # initialized from initial_alpha. PRNGKey(0) picks a positive value.
    key = jax.random.PRNGKey(0)
    k_alpha, k_x = jax.random.split(key)
    initial_alpha = float(jax.random.uniform(k_alpha, (), minval=0.05, maxval=1.0))

    log_alpha, alpha_forward = make_alpha(initial_alpha)

    # Forward pass (standalone Alpha.forward()).
    alpha = alpha_forward(log_alpha)
    jax.block_until_ready(alpha)
    expected = jnp.exp(jnp.float32(math.log(initial_alpha)))
    assert alpha.shape == ()
    assert jnp.allclose(alpha, expected, rtol=1e-6, atol=1e-6), (alpha, expected)

    # Gradient check: SAC-style temperature updates need
    # d alpha / d log_alpha = alpha to flow through the Pallas call.
    grad = jax.grad(alpha_forward)(log_alpha)
    jax.block_until_ready(grad)
    assert grad.shape == (1, 1)
    assert jnp.allclose(grad[0, 0], expected, rtol=1e-6, atol=1e-6), (grad, expected)

    # Fused-consumer pattern: exp(log_alpha) computed inside the consumer
    # kernel from an SMEM scalar (no standalone alpha launch).
    x = jax.random.normal(k_x, (256, 128), dtype=jnp.float32)
    y = jax.jit(scale_by_alpha)(log_alpha, x)
    jax.block_until_ready(y)
    y_ref = x * jnp.exp(log_alpha[0, 0])
    assert jnp.allclose(y, y_ref, rtol=1e-5, atol=1e-5), "fused consumer mismatch"

    print("KERNEL_OK")
</pallas_src>

<mosaic_0001>
module attributes {stable_mosaic.version = 11 : i64} {
  func.func @_alpha_kernel(%arg0: memref<1x1xf32, #tpu.memory_space<vmem>>, %arg1: memref<1x1xf32, #tpu.memory_space<vmem>>) attributes {dimension_semantics = [], scalar_prefetch = 0 : i64, scratch_operands = 0 : i64, tpu.core_type = #tpu.core_type<tc>} {
    %c0 = arith.constant 0 : index
    %c0_0 = arith.constant 0 : index
    %0 = vector.load %arg0[%c0, %c0_0] : memref<1x1xf32, #tpu.memory_space<vmem>>, vector<1x1xf32>
    %1 = math.exp %0 : vector<1x1xf32>
    %c0_1 = arith.constant 0 : index
    %c0_2 = arith.constant 0 : index
    %2 = vector.load %arg1[%c0_1, %c0_2] : memref<1x1xf32, #tpu.memory_space<vmem>>, vector<1x1xf32>
    tpu.vector_store %arg1[%c0_1, %c0_2], %1 {strides = array<i32>} : memref<1x1xf32, #tpu.memory_space<vmem>>, vector<1x1xf32>,
    return
  }
}

</mosaic_0001>

<bundles_post_ra>
// kernel: forward.1
= control target key start
LH: loop header
LB: loop body
LE: loop exit
PB: predicated region body
PF: predicated region fallthrough
CT: control target
= control target key end

     0   :  { %s83_s0 = inlined_call_operand.<no memory space> [shape: f32[1,1], index: 0, kind: input, shape index: {}, may-alias: {0,1}]   ;;  %s84_s1 = inlined_call_operand.hbm [shape: f32[1,1], index: 1, kind: output, shape index: {}, may-alias: {0,1}]  }
   0x1   :  { %v6_v0 = vstv %s83_s0 }
   0x2   :  { %7 = vst [vmem:[#allocation2] sm:$0x1] %v6_v0 }
   0x9   :  { %v11_v1 = vld [vmem:[#allocation2] sm:$0x1] }
   0xa   :  { %8 = vsyncpa [#allocation4], 0  ;;  %v12_v2 = vmul.f32 1.442695, %v11_v1  ;;  %s57_s8 = smov [#allocation3]   ;;  %vm14_vm0 = vcmask 0  }
   0xb   :  { %s22_s9 = sshll.u32 %s57_s8, 4  ;;  %s23_s9 = int_to_ptr.vmem [resolvable:$true] %s22_s9 }
   0xc   :  { %31 = vpow2.f32 %v12_v2  ;;  %s33_s10 = scalar_lea.vmem %s23_s9, 16  ;;  %s37_s11 = scalar_lea.vmem %s23_s9, 32 }
   0xd   :  { %p34_p0 = scmp.ne.s32.totalorder %s23_s9, %s33_s10  ;;  %p38_p1 = scmp.lt.s32.totalorder %s23_s9, %s23_s9 }
   0xe   :  { %p39_p2 = scmp.lt.s32.totalorder %s37_s11, %s33_s10 }
  0x10   :  { %p40_p3 = por %p39_p2, %p38_p1 }
  0x12   :  { %p41_p4 = pnand %p40_p3, %p34_p0 }
  0x16   :  { %v32_v3 = vpop.eup %31 }
  0x17   :  { %15 = vst.msk [vmem:[#allocation3] sm:$0x1] %vm14_vm0, %v32_v3 }
  0x18   :  { %44 = shalt.err (!%p41_p4)
}
  0x19   :  { %s45_s13 = scalar_lea.hbm %s84_s1, 16 }
  0x1a   :  { %p46_p5 = scmp.ne.s32.totalorder %s84_s1, %s45_s13  ;;  %p49_p6 = scmp.lt.u32.totalorder %s45_s13, %s84_s1 }
  0x1c   :  { %p51_p7 = pnand %p49_p6, %p46_p5 }
  0x1e   :  { %54 = shalt.err (!%p51_p7)
}
  0x1f   :  { %25 = dma.vmem_to_hbm [thread:$0]  %s23_s9, 16, %s84_s1, [#allocation4]  }
  0x20   :  { %55 = dma.done.wait [#allocation4], 16  }
  0x21   :  { %56 = vsyncadd [#allocation4], 4294967280 }
  0x22   :  { %29 = vsyncpa [#allocation4], 1 }

</bundles_post_ra>
